<compile_context>
chip_gen: v6e
topology: v6e:2x2x1
jax: 0.10.0
libtpu: 0.0.40
codegen_flags: <defaults>
</compile_context>

<pallas_src>
import math

import jax
import jax.numpy as jnp
from jax.experimental import pallas as pl
from jax.experimental.pallas import tpu as pltpu


def _round_up(x, m):
    return ((x + m - 1) // m) * m


# ---------------------------------------------------------------------------
# Per-generation tiling / VMEM knobs.
#   v7x  : 64 MiB physical VMEM  -> 512-row elementwise tiles, <=48 MiB scoped
#   v5e/6e: 128 MiB physical VMEM -> 1024-row elementwise tiles, ~100 MiB scoped
# Edge (gather) kernels issue one small row-DMA per edge, so their tile is capped
# at 256 rows to bound the number of in-flight DMAs.
# ---------------------------------------------------------------------------
def _tpu_defaults():
    vmem_cap = 64 * 1024 * 1024
    try:
        info = pltpu.get_tpu_info()
        cap = getattr(info, "vmem_capacity_bytes", None)
        if cap:
            vmem_cap = int(cap)
    except Exception:
        pass
    if vmem_cap <= 64 * 1024 * 1024:          # v7x-class
        node_tile, limit = 512, 48 * 1024 * 1024
    else:                                     # v5e / v6e
        node_tile, limit = 1024, 100 * 1024 * 1024
    limit = min(limit, vmem_cap * 3 // 4)
    edge_tile = 256
    return node_tile, edge_tile, limit


_MAX_NODE_TILE, _MAX_EDGE_TILE, _VMEM_LIMIT = _tpu_defaults()

_ROW_PARAMS = pltpu.CompilerParams(
    dimension_semantics=("parallel",), vmem_limit_bytes=_VMEM_LIMIT)


# ---------------------------------------------------------------------------
# In-kernel row gather: buf[e] <- hbm[idx[base + e]]  (one small DMA per row)
# ---------------------------------------------------------------------------
def _gather_rows_start(hbm_ref, idx_ref, base, buf_ref, sem):
    @pl.loop(0, buf_ref.shape[0])
    def _(e):
        pltpu.make_async_copy(
            hbm_ref.at[idx_ref[base + e]], buf_ref.at[e], sem).start()


def _gather_rows_wait(hbm_ref, buf_ref, sem):
    @pl.loop(0, buf_ref.shape[0])
    def _(e):
        pltpu.make_async_copy(hbm_ref.at[0], buf_ref.at[e], sem).wait()


# ---------------------------------------------------------------------------
# Kernel 1: fused node projections with two outputs
#   x_l = emb @ (sqrt(d)*Wl) + bl ;  x_r = emb @ (sqrt(d)*Wr) + br
# ---------------------------------------------------------------------------
def _node_proj_kernel(e_ref, wl_ref, wr_ref, bl_ref, br_ref, xl_ref, xr_ref):
    e = e_ref[...]
    xl_ref[...] = jnp.dot(e, wl_ref[...],
                          preferred_element_type=jnp.float32) + bl_ref[...]
    xr_ref[...] = jnp.dot(e, wr_ref[...],
                          preferred_element_type=jnp.float32) + br_ref[...]


def node_projection(emb, wl, wr, bl, br, row_tile):
    n_pad, dim = emb.shape
    return pl.pallas_call(
        _node_proj_kernel,
        out_shape=(jax.ShapeDtypeStruct((n_pad, dim), jnp.float32),
                   jax.ShapeDtypeStruct((n_pad, dim), jnp.float32)),
        grid=(n_pad // row_tile,),
        in_specs=[pl.BlockSpec((row_tile, dim), lambda i: (i, 0)),
                  pl.BlockSpec((dim, dim), lambda i: (0, 0)),
                  pl.BlockSpec((dim, dim), lambda i: (0, 0)),
                  pl.BlockSpec((1, dim), lambda i: (0, 0)),
                  pl.BlockSpec((1, dim), lambda i: (0, 0))],
        out_specs=[pl.BlockSpec((row_tile, dim), lambda i: (i, 0)),
                   pl.BlockSpec((row_tile, dim), lambda i: (i, 0))],
        compiler_params=_ROW_PARAMS,
    )(emb, wl, wr, bl, br)


# ---------------------------------------------------------------------------
# Kernel 2: fused per-edge gather + edge projection + GATv2 attention logits
#   x_j = x_l[src[e]], x_i = x_r[dst[e]]   (DMA gather from HBM)
#   ep  = ea @ We + be
#   s   = leaky_relu(x_i + x_j + ep, 0.2)
#   out^T = att_T @ s^T      (emitted transposed: lane dim = edge axis, 128-dense)
# ---------------------------------------------------------------------------
def _edge_logits_kernel(src_ref, dst_ref, ea_ref, we_ref, be_ref, att_ref,
                        xl_hbm, xr_hbm, o_ref, xj_buf, xi_buf, sem):
    base = pl.program_id(0) * xj_buf.shape[0]
    _gather_rows_start(xl_hbm, src_ref, base, xj_buf, sem.at[0])
    _gather_rows_start(xr_hbm, dst_ref, base, xi_buf, sem.at[1])
    # edge-feature projection overlaps with the row-gather DMAs
    ep = jnp.dot(ea_ref[...], we_ref[...],
                 preferred_element_type=jnp.float32) + be_ref[...]
    _gather_rows_wait(xl_hbm, xj_buf, sem.at[0])
    _gather_rows_wait(xr_hbm, xi_buf, sem.at[1])
    s = xi_buf[...] + xj_buf[...] + ep
    s = jnp.where(s > 0, s, 0.2 * s)              # GATv2 negative_slope = 0.2
    o_ref[...] = jax.lax.dot_general(
        att_ref[...], s, (((1,), (1,)), ((), ())),
        preferred_element_type=jnp.float32)


def edge_logits(src_idx, dst_idx, ea, we, be, att_t, x_l, x_r, row_tile):
    e_pad, de = ea.shape
    dim = we.shape[1]
    hp = att_t.shape[0]
    return pl.pallas_call(
        _edge_logits_kernel,
        out_shape=jax.ShapeDtypeStruct((hp, e_pad), jnp.float32),
        grid_spec=pltpu.PrefetchScalarGridSpec(
            num_scalar_prefetch=2,
            grid=(e_pad // row_tile,),
            in_specs=[
                pl.BlockSpec((row_tile, de), lambda i, s, d: (i, 0)),
                pl.BlockSpec((de, dim), lambda i, s, d: (0, 0)),
                pl.BlockSpec((1, dim), lambda i, s, d: (0, 0)),
                pl.BlockSpec((hp, dim), lambda i, s, d: (0, 0)),
                pl.BlockSpec(memory_space=pl.ANY),     # x_l stays in HBM
                pl.BlockSpec(memory_space=pl.ANY),     # x_r stays in HBM
            ],
            out_specs=pl.BlockSpec((hp, row_tile), lambda i, s, d: (0, i)),
            scratch_shapes=[pltpu.VMEM((row_tile, dim), jnp.float32),
                            pltpu.VMEM((row_tile, dim), jnp.float32),
                            pltpu.SemaphoreType.DMA((2,))],
        ),
        compiler_params=_ROW_PARAMS,
    )(src_idx, dst_idx, ea, we, be, att_t, x_l, x_r)


# ---------------------------------------------------------------------------
# Kernel 3: fused per-edge gather + alpha weighting
#   x_j = x_l[src[e]]      (DMA gather from HBM, no (E, dim) intermediate)
#   out = x_j * (alpha @ head-pool matrix)
# ---------------------------------------------------------------------------
def _alpha_weight_kernel(src_ref, a_ref, pool_ref, xl_hbm, o_ref, xj_buf, sem):
    base = pl.program_id(0) * xj_buf.shape[0]
    _gather_rows_start(xl_hbm, src_ref, base, xj_buf, sem.at[0])
    a_full = jnp.dot(a_ref[...], pool_ref[...],
                     preferred_element_type=jnp.float32)
    _gather_rows_wait(xl_hbm, xj_buf, sem.at[0])
    o_ref[...] = xj_buf[...] * a_full


def alpha_weight(src_idx, alpha, pool, x_l, row_tile):
    e_pad, hp = alpha.shape
    dim = pool.shape[1]
    return pl.pallas_call(
        _alpha_weight_kernel,
        out_shape=jax.ShapeDtypeStruct((e_pad, dim), jnp.float32),
        grid_spec=pltpu.PrefetchScalarGridSpec(
            num_scalar_prefetch=1,
            grid=(e_pad // row_tile,),
            in_specs=[
                pl.BlockSpec((row_tile, hp), lambda i, s: (i, 0)),
                pl.BlockSpec((hp, dim), lambda i, s: (0, 0)),
                pl.BlockSpec(memory_space=pl.ANY),     # x_l stays in HBM
            ],
            out_specs=pl.BlockSpec((row_tile, dim), lambda i, s: (i, 0)),
            scratch_shapes=[pltpu.VMEM((row_tile, dim), jnp.float32),
                            pltpu.SemaphoreType.DMA((1,))],
        ),
        compiler_params=_ROW_PARAMS,
    )(src_idx, alpha, pool, x_l)


# ---------------------------------------------------------------------------
# Kernel 4: folded GAT bias + BatchNorm1d(eval) + LeakyReLU(0.01)
#   scale = gamma * rsqrt(var + eps);  shift = (gat_bias - mean) * scale + beta
# ---------------------------------------------------------------------------
def _bn_leaky_kernel(h_ref, s_ref, t_ref, o_ref):
    y = h_ref[...] * s_ref[...] + t_ref[...]
    o_ref[...] = jnp.where(y > 0, y, 0.01 * y)    # F.leaky_relu default slope


def bn_leaky(h, scale, shift, row_tile):
    n_pad, dim = h.shape
    return pl.pallas_call(
        _bn_leaky_kernel,
        out_shape=jax.ShapeDtypeStruct((n_pad, dim), jnp.float32),
        grid=(n_pad // row_tile,),
        in_specs=[pl.BlockSpec((row_tile, dim), lambda i: (i, 0)),
                  pl.BlockSpec((1, dim), lambda i: (0, 0)),
                  pl.BlockSpec((1, dim), lambda i: (0, 0))],
        out_specs=pl.BlockSpec((row_tile, dim), lambda i: (i, 0)),
        compiler_params=_ROW_PARAMS,
    )(h, scale, shift)


# ---------------------------------------------------------------------------
# Parameter preparation (done once, outside the hot path):
#   - fold sqrt(dim) into Wl/Wr
#   - build the (H_pad, dim) block-diagonal attention matrix and head-pool matrix
#   - fold GAT bias + BatchNorm(eval) into a single scale/shift pair
# NOTE: no 128-lane feature padding anywhere (activations keep width = dim).
# ---------------------------------------------------------------------------
def prepare_params(params, dim, dim_edge, num_head, eps=1e-5):
    f32 = jnp.float32
    hp = _round_up(num_head, 8)
    c = dim // num_head
    scale = math.sqrt(dim)

    rows = jnp.repeat(jnp.arange(num_head), c)                        # (dim,)
    cols = jnp.arange(dim)
    att_t = jnp.zeros((hp, dim), f32).at[rows, cols].set(
        params["att"].reshape(-1).astype(f32))                        # (Hp, dim)
    pool = jnp.zeros((hp, dim), f32).at[rows, cols].set(1.0)          # (Hp, dim)

    bn_s = params["bn_gamma"] * jax.lax.rsqrt(params["bn_var"] + eps)
    bn_t = (params["gat_bias"] - params["bn_mean"]) * bn_s + params["bn_beta"]

    return {
        "emb_table": params["emb_table"].astype(f32),
        "Wl": (params["Wl"] * scale).astype(f32),
        "Wr": (params["Wr"] * scale).astype(f32),
        "bl": params["bl"].astype(f32)[None, :],
        "br": params["br"].astype(f32)[None, :],
        "We": params["We"].astype(f32),
        "be": params["be"].astype(f32)[None, :],
        "att_T": att_t, "pool": pool,
        "bn_scale": bn_s.astype(f32)[None, :],
        "bn_shift": bn_t.astype(f32)[None, :],
    }


# ---------------------------------------------------------------------------
# Full forward pass (eval mode)
# ---------------------------------------------------------------------------
def graph_embedding_forward(prep, x_tokens, edge_index, edge_attr, *, dim, num_head):
    n = x_tokens.shape[0]
    h = num_head
    hp = prep["att_T"].shape[0]

    tn = min(_MAX_NODE_TILE, _round_up(n, 8))
    n_pad = _round_up(n, tn)

    # --- Embeddings lookup (gather, plain JAX); sqrt(d_model) folded into Wl/Wr.
    # Dropout: identity in eval mode.
    # TODO(synk): this gather could also be fused into kernel 1 via scalar-prefetched
    # token ids + in-kernel DMA gather of embedding rows.
    emb = jnp.take(prep["emb_table"], x_tokens, axis=0)               # (N, dim)
    emb = jnp.pad(emb, ((0, n_pad - n), (0, 0)))

    # --- fused lin_l / lin_r projections, two outputs (Pallas, MXU)
    x_l, x_r = node_projection(emb, prep["Wl"], prep["Wr"],
                               prep["bl"], prep["br"], tn)            # 2x (N_pad, dim)

    # --- add self loops; edge_attr fill_value='mean' over incoming edges (dst).
    # NOTE: assumes no pre-existing self loops in the input graph.
    src, dst = edge_index[0].astype(jnp.int32), edge_index[1].astype(jnp.int32)
    e = src.shape[0]
    deg = jax.ops.segment_sum(jnp.ones((e,), jnp.float32), dst, num_segments=n)
    loop_attr = (jax.ops.segment_sum(edge_attr, dst, num_segments=n)
                 / jnp.maximum(deg, 1.0)[:, None])
    loop_idx = jnp.arange(n, dtype=jnp.int32)
    src2 = jnp.concatenate([src, loop_idx])
    dst2 = jnp.concatenate([dst, loop_idx])
    ea2 = jnp.concatenate([edge_attr, loop_attr], axis=0)             # (E', dim_edge)
    e2 = e + n

    te = min(_MAX_EDGE_TILE, _round_up(e2, 128))
    e_pad = _round_up(e2, te)
    src2_p = jnp.pad(src2, (0, e_pad - e2))          # padded idx = 0 (in range)
    dst2_p = jnp.pad(dst2, (0, e_pad - e2))
    ea2_p = jnp.pad(ea2, ((0, e_pad - e2), (0, 0)))

    # --- fused per-edge gather + edge projection + attention logits (Pallas);
    # output transposed (H_pad, E_pad) so the stored lane dim (edges) is 128-dense.
    logits_t = edge_logits(src2_p, dst2_p, ea2_p, prep["We"], prep["be"],
                           prep["att_T"], x_l, x_r, te)
    logits = logits_t[:h, :e2].T                                      # (E', H)

    # --- segment softmax over target nodes (irregular, tiny E'xH, plain JAX)
    seg_max = jax.ops.segment_max(logits, dst2, num_segments=n)
    ex = jnp.exp(logits - seg_max[dst2])
    denom = jax.ops.segment_sum(ex, dst2, num_segments=n)
    alpha = ex / denom[dst2]            # attention dropout: identity (eval)
    alpha_p = jnp.pad(alpha, ((0, e_pad - e2), (0, hp - h)))          # (E_pad, Hp)

    # --- fused per-edge gather + alpha weighting (Pallas)
    weighted = alpha_weight(src2_p, alpha_p, prep["pool"], x_l, te)   # (E_pad, dim)

    # --- scatter-add aggregation over target nodes (irregular, plain JAX);
    # padded rows of `weighted` are exactly zero so padded dst (=0) are harmless.
    # TODO(synk): fuse this segment_sum + the BN/LeakyReLU epilogue into a single
    # sorted-by-dst Pallas kernel (scalar-prefetched segment offsets) to eliminate
    # the (E, dim) HBM round-trip of `weighted`.
    h_out = jax.ops.segment_sum(weighted, dst2_p, num_segments=n)     # (N, dim)

    # --- GAT bias + BatchNorm1d(eval) + LeakyReLU(0.01) (Pallas epilogue)
    h_out = jnp.pad(h_out, ((0, n_pad - n), (0, 0)))
    out = bn_leaky(h_out, prep["bn_scale"], prep["bn_shift"], tn)
    return out[:n]


# ---------------------------------------------------------------------------
# Deterministic parameter init + example run
# ---------------------------------------------------------------------------
def init_params(key, size_vocab, dim, dim_edge, num_head):
    ks = jax.random.split(key, 13)
    c = dim // num_head
    f32 = jnp.float32

    def nrm(k, shape, s=0.1):
        return (s * jax.random.normal(k, shape)).astype(f32)

    return {
        "emb_table": nrm(ks[0], (size_vocab, dim), 1.0),
        "Wl": nrm(ks[1], (dim, dim)), "bl": nrm(ks[2], (dim,)),
        "Wr": nrm(ks[3], (dim, dim)), "br": nrm(ks[4], (dim,)),
        "We": nrm(ks[5], (dim_edge, dim)), "be": nrm(ks[6], (dim,)),
        "att": nrm(ks[7], (num_head, c), 1.0),
        "gat_bias": nrm(ks[8], (dim,)),
        "bn_gamma": (1.0 + 0.1 * jax.random.normal(ks[9], (dim,))).astype(f32),
        "bn_beta": nrm(ks[10], (dim,)),
        "bn_mean": nrm(ks[11], (dim,)),
        "bn_var": (0.5 + jnp.abs(0.5 * jax.random.normal(ks[12], (dim,)))).astype(f32),
    }


if __name__ == "__main__":
    size_vocab, dim, dim_edge, num_head = 20, 32, 8, 4
    n_nodes, n_edges = 10, 24

    key = jax.random.PRNGKey(0)
    kp, kx, ksrc, kd, ke = jax.random.split(key, 5)

    params = init_params(kp, size_vocab, dim, dim_edge, num_head)
    prep = prepare_params(params, dim, dim_edge, num_head)

    x = jax.random.randint(kx, (n_nodes,), 0, size_vocab, dtype=jnp.int32)
    src = jax.random.randint(ksrc, (n_edges,), 0, n_nodes, dtype=jnp.int32)
    # guarantee no self loops in the input graph (GATv2Conv would strip them anyway)
    dst = (src + jax.random.randint(kd, (n_edges,), 1, n_nodes, dtype=jnp.int32)) % n_nodes
    ei = jnp.stack([src, dst], axis=0)                                # (2, E)
    ew = (0.3 * jax.random.normal(ke, (n_edges, dim_edge))).astype(jnp.float32)

    out = graph_embedding_forward(prep, x, ei, ew, dim=dim, num_head=num_head)
    out = jax.block_until_ready(out)
    assert out.shape == (n_nodes, dim) and out.dtype == jnp.float32
    assert bool(jnp.all(jnp.isfinite(out)))
    print("KERNEL_OK")
</pallas_src>

<mosaic_0001>
module attributes {stable_mosaic.version = 11 : i64} {
  func.func @_node_proj_kernel(%arg0: i32, %arg1: memref<16x32xf32, #tpu.memory_space<vmem>>, %arg2: memref<32x32xf32, #tpu.memory_space<vmem>>, %arg3: memref<32x32xf32, #tpu.memory_space<vmem>>, %arg4: memref<1x32xf32, #tpu.memory_space<vmem>>, %arg5: memref<1x32xf32, #tpu.memory_space<vmem>>, %arg6: memref<16x32xf32, #tpu.memory_space<vmem>>, %arg7: memref<16x32xf32, #tpu.memory_space<vmem>>) attributes {dimension_semantics = [#tpu.dimension_semantics<parallel>], iteration_bounds = array<i64: 1>, scalar_prefetch = 0 : i64, scratch_operands = 0 : i64, tpu.core_type = #tpu.core_type<tc>, window_params = [{transform_indices = @transform_0, window_bounds = array<i64: 16, 32>}, {pipeline_mode = #tpu.pipeline_mode<synchronous>, transform_indices = @transform_1, window_bounds = array<i64: 32, 32>}, {pipeline_mode = #tpu.pipeline_mode<synchronous>, transform_indices = @transform_2, window_bounds = array<i64: 32, 32>}, {pipeline_mode = #tpu.pipeline_mode<synchronous>, transform_indices = @transform_3, window_bounds = array<i64: 1, 32>}, {pipeline_mode = #tpu.pipeline_mode<synchronous>, transform_indices = @transform_4, window_bounds = array<i64: 1, 32>}, {transform_indices = @transform_5, window_bounds = array<i64: 16, 32>}, {transform_indices = @transform_6, window_bounds = array<i64: 16, 32>}]} {
    %c0 = arith.constant 0 : index
    %c0_0 = arith.constant 0 : index
    %0 = vector.load %arg1[%c0, %c0_0] : memref<16x32xf32, #tpu.memory_space<vmem>>, vector<16x32xf32>
    %c0_1 = arith.constant 0 : index
    %c0_2 = arith.constant 0 : index
    %1 = vector.load %arg2[%c0_1, %c0_2] : memref<32x32xf32, #tpu.memory_space<vmem>>, vector<32x32xf32>
    %cst = arith.constant dense<0.000000e+00> : vector<16x32xf32>
    %2 = tpu.matmul %0, %1, %cst {dimension_numbers = #tpu.dot_dimension_numbers<[1], [0], [0], [1], [0, 0, 1, 1], [], []>} : vector<16x32xf32>, vector<32x32xf32>, vector<16x32xf32> -> vector<16x32xf32>
    %c0_3 = arith.constant 0 : index
    %c0_4 = arith.constant 0 : index
    %3 = vector.load %arg4[%c0_3, %c0_4] : memref<1x32xf32, #tpu.memory_space<vmem>>, vector<1x32xf32>
    %4 = vector.broadcast %3 : vector<1x32xf32> to vector<16x32xf32>
    %5 = arith.addf %2, %4 : vector<16x32xf32>
    %c0_5 = arith.constant 0 : index
    %c0_6 = arith.constant 0 : index
    %6 = vector.load %arg6[%c0_5, %c0_6] : memref<16x32xf32, #tpu.memory_space<vmem>>, vector<16x32xf32>
    tpu.vector_store %arg6[%c0_5, %c0_6], %5 {strides = array<i32>} : memref<16x32xf32, #tpu.memory_space<vmem>>, vector<16x32xf32>,
    %c0_7 = arith.constant 0 : index
    %c0_8 = arith.constant 0 : index
    %7 = vector.load %arg3[%c0_7, %c0_8] : memref<32x32xf32, #tpu.memory_space<vmem>>, vector<32x32xf32>
    %cst_9 = arith.constant dense<0.000000e+00> : vector<16x32xf32>
    %8 = tpu.matmul %0, %7, %cst_9 {dimension_numbers = #tpu.dot_dimension_numbers<[1], [0], [0], [1], [0, 0, 1, 1], [], []>} : vector<16x32xf32>, vector<32x32xf32>, vector<16x32xf32> -> vector<16x32xf32>
    %c0_10 = arith.constant 0 : index
    %c0_11 = arith.constant 0 : index
    %9 = vector.load %arg5[%c0_10, %c0_11] : memref<1x32xf32, #tpu.memory_space<vmem>>, vector<1x32xf32>
    %10 = vector.broadcast %9 : vector<1x32xf32> to vector<16x32xf32>
    %11 = arith.addf %8, %10 : vector<16x32xf32>
    %c0_12 = arith.constant 0 : index
    %c0_13 = arith.constant 0 : index
    %12 = vector.load %arg7[%c0_12, %c0_13] : memref<16x32xf32, #tpu.memory_space<vmem>>, vector<16x32xf32>
    tpu.vector_store %arg7[%c0_12, %c0_13], %11 {strides = array<i32>} : memref<16x32xf32, #tpu.memory_space<vmem>>, vector<16x32xf32>,
    return
  }
  func.func @transform_0(%arg0: i32) -> (i32, i32) {
    %c0_i32 = arith.constant 0 : i32
    %c0_i32_0 = arith.constant 0 : i32
    return %arg0, %c0_i32 : i32, i32
  }
  func.func @transform_1(%arg0: i32) -> (i32, i32) {
    %c0_i32 = arith.constant 0 : i32
    %c0_i32_0 = arith.constant 0 : i32
    %c0_i32_1 = arith.constant 0 : i32
    return %c0_i32, %c0_i32_0 : i32, i32
  }
  func.func @transform_2(%arg0: i32) -> (i32, i32) {
    %c0_i32 = arith.constant 0 : i32
    %c0_i32_0 = arith.constant 0 : i32
    %c0_i32_1 = arith.constant 0 : i32
    return %c0_i32, %c0_i32_0 : i32, i32
  }
  func.func @transform_3(%arg0: i32) -> (i32, i32) {
    %c0_i32 = arith.constant 0 : i32
    %c0_i32_0 = arith.constant 0 : i32
    %c0_i32_1 = arith.constant 0 : i32
    return %c0_i32, %c0_i32_0 : i32, i32
  }
  func.func @transform_4(%arg0: i32) -> (i32, i32) {
    %c0_i32 = arith.constant 0 : i32
    %c0_i32_0 = arith.constant 0 : i32
    %c0_i32_1 = arith.constant 0 : i32
    return %c0_i32, %c0_i32_0 : i32, i32
  }
  func.func @transform_5(%arg0: i32) -> (i32, i32) {
    %c0_i32 = arith.constant 0 : i32
    %c0_i32_0 = arith.constant 0 : i32
    return %arg0, %c0_i32 : i32, i32
  }
  func.func @transform_6(%arg0: i32) -> (i32, i32) {
    %c0_i32 = arith.constant 0 : i32
    %c0_i32_0 = arith.constant 0 : i32
    return %arg0, %c0_i32 : i32, i32
  }
}

</mosaic_0001>

<bundles_post_ra>
// kernel: tpu_custom_call.1
= control target key start
LH: loop header
LB: loop body
LE: loop exit
PB: predicated region body
PF: predicated region fallthrough
CT: control target
= control target key end

     0   :  { %12 = vsyncpa [#allocation3], 0  ;;  %s525_s0 = inlined_call_operand.hbm [shape: f32[16,32], index: 0, kind: input, shape index: {}]   ;;  %s526_s1 = inlined_call_operand.hbm [shape: f32[32,32], index: 1, kind: input, shape index: {}]   ;;  %s527_s2 = inlined_call_operand.hbm [shape: f32[32,32], index: 2, kind: input, shape index: {}]   ;;  %s528_s3 = inlined_call_operand.vmem [shape: f32[1,32], index: 3, kind: input, shape index: {}]   ;;  %s529_s4 = inlined_call_operand.vmem [shape: f32[1,32], index: 4, kind: input, shape index: {}]   ;;  %s530_s5 = inlined_call_operand.hbm [shape: f32[16,32], index: 5, kind: output, shape index: {0}]   ;;  %s531_s6 = inlined_call_operand.hbm [shape: f32[16,32], index: 6, kind: output, shape index: {1}]  }
   0x1   :  { %13 = vsyncpa [#allocation6], 0 }
   0x2   :  { %14 = vsyncpa [#allocation4], 0 }
   0x3   :  { %15 = vsyncpa [#allocation10], 0  ;;  %s439_s21 = smov [#allocation5]   ;;  %s440_s23 = smov [#allocation2]  }
   0x4   :  { %s33_s22 = sshll.u32 %s439_s21, 4  ;;  %s21_s24 = sshll.u32 %s440_s23, 4  ;;  %s34_s22 = int_to_ptr.vmem [resolvable:$true] %s33_s22  ;;  %s22_s24 = int_to_ptr.vmem [resolvable:$true] %s21_s24 }
   0x5   :  { %s339_s25 = scalar_lea.vmem %s34_s22, 512  ;;  %p344_p1 = scmp.lt.s32.totalorder %s34_s22, %s34_s22 }
   0x6   :  { %p340_p0 = scmp.ne.s32.totalorder %s34_s22, %s339_s25  ;;  %p345_p2 = scmp.lt.s32.totalorder %s339_s25, %s339_s25 }
   0x8   :  { %p346_p3 = por %p345_p2, %p344_p1 }
   0xa   :  { %p347_p4 = pnand %p346_p3, %p340_p0 }
   0xc   :  { %350 = shalt.err (!%p347_p4)
}
   0xd   :  { %s441_s26 = smov 128   ;;  %s442_s27 = smov 8  }
   0xe   :  { %39 = dma.hbm_to_vmem [thread:$0]  %s526_s1, 512, %s34_s22, [#allocation6], %s441_s26, %s441_s26, %s442_s27  }
   0xf   :  { %s359_s30 = scalar_lea.vmem %s22_s24, 256  ;;  %p364_p6 = scmp.lt.s32.totalorder %s22_s24, %s22_s24 }
  0x10   :  { %p360_p5 = scmp.ne.s32.totalorder %s22_s24, %s359_s30  ;;  %p365_p7 = scmp.lt.s32.totalorder %s359_s30, %s359_s30 }
  0x12   :  { %p366_p8 = por %p365_p7, %p364_p6 }
  0x14   :  { %p367_p9 = pnand %p366_p8, %p360_p5 }
  0x16   :  { %370 = shalt.err (!%p367_p9)
}
  0x17   :  { %27 = dma.hbm_to_vmem [thread:$0]  %s525_s0, 256, %s22_s24, [#allocation3], %s441_s26, %s441_s26, %s442_s27  }
  0x18   :  { %s443_s9 = smov [#allocation7]  }
  0x19   :  { %s45_s10 = sshll.u32 %s443_s9, 4  ;;  %s46_s10 = int_to_ptr.vmem [resolvable:$true] %s45_s10 }
  0x1a   :  { %s379_s11 = scalar_lea.vmem %s46_s10, 512  ;;  %p384_p11 = scmp.lt.s32.totalorder %s46_s10, %s46_s10 }
  0x1b   :  { %p380_p10 = scmp.ne.s32.totalorder %s46_s10, %s379_s11  ;;  %p385_p12 = scmp.lt.s32.totalorder %s379_s11, %s379_s11 }
  0x1d   :  { %p386_p13 = por %p385_p12, %p384_p11 }
  0x1f   :  { %p387_p0 = pnand %p386_p13, %p380_p10 }
  0x21   :  { %390 = shalt.err (!%p387_p0)
}
  0x22   :  { %51 = dma.hbm_to_vmem [thread:$0]  %s527_s2, 512, %s46_s10, [#allocation6], %s441_s26, %s441_s26, %s442_s27  }
  0x23   :  { %431 = dma.done.wait [#allocation3], 256  }
  0x24   :  { %432 = vsyncadd [#allocation3], 4294967040 }
  0x25   :  { %433 = dma.done.wait [#allocation6], 1024  }
  0x26   :  { %434 = vsyncadd [#allocation6], 4294966272  ;;  %v70_v0 = vld [vmem:[#allocation5 + $0x18] sm:$0xff]  ;;  %v69_v2 = vld [vmem:[#allocation5 + $0x10] sm:$0xff]  ;;  %vm78_vm0 = vcmask 261120   ;;  %s444_s15 = smov [#allocation8]  }
  0x27   :  { %v165_v1 = vld [vmem:[#allocation7 + $0x18] sm:$0xff]  ;;  %302 = vmatprep.subr.mxu0 %v70_v0  ;;  %v164_v3 = vld [vmem:[#allocation7 + $0x10] sm:$0xff]  ;;  %v68_v4 = vld [vmem:[#allocation5 + $0x8] sm:$0xff]  ;;  %s255_s16 = sshll.u32 %s444_s15, 4  ;;  %s445_s17 = smov [#allocation9]   ;;  %s256_s16 = int_to_ptr.vmem [resolvable:$true] %s255_s16 }
  0x28   :  { %313 = vmatprep.subr.mxu1 %v165_v1  ;;  %303 = vmatpush3.msra.mxu0 %v70_v0  ;;  %v163_v5 = vld [vmem:[#allocation7 + $0x8] sm:$0xff]  ;;  %v67_v6 = vld [vmem:[#allocation5] sm:$0xff]  ;;  %v65_v8 = vld [vmem:[#allocation2] sm:$0xff]  ;;  %s267_s18 = sshll.u32 %s445_s17, 4  ;;  %p396_p2 = scmp.lt.s32.totalorder %s256_s16, %s256_s16  ;;  %s268_s18 = int_to_ptr.vmem [resolvable:$true] %s267_s18 }
  0x29   :  { %314 = vmatpush3.msra.mxu1 %v165_v1  ;;  %304 = vmatprep.subr.mxu0 %v69_v2  ;;  %v162_v7 = vld [vmem:[#allocation7] sm:$0xff]  ;;  %v66_v9 = vld [vmem:[#allocation2 + $0x8] sm:$0xff]  ;;  %v284_v10 = vld [vmem:[%s528_s3] ss:$0 sm:$0xff]  ;;  %s391_s3 = scalar_lea.vmem %s256_s16, 256 }
  0x2a   :  { %315 = vmatprep.subr.mxu1 %v164_v3  ;;  %305 = vmatpush3.msra.mxu0 %v69_v2  ;;  %v287_v11 = vld [vmem:[%s529_s4] ss:$0 sm:$0xff]  ;;  %p392_p1 = scmp.ne.s32.totalorder %s256_s16, %s391_s3  ;;  %p397_p3 = scmp.lt.s32.totalorder %s391_s3, %s391_s3 }
  0x2b   :  { %316 = vmatpush3.msra.mxu1 %v164_v3  ;;  %306 = vmatprep.subr.mxu0 %v68_v4 }
  0x2c   :  { %317 = vmatprep.subr.mxu1 %v163_v5  ;;  %307 = vmatpush3.msra.mxu0 %v68_v4  ;;  %p398_p4 = por %p397_p3, %p396_p2 }
  0x2d   :  { %318 = vmatpush3.msra.mxu1 %v163_v5  ;;  %308 = vmatprep.subr.mxu0 %v67_v6 }
  0x2e   :  { %319 = vmatprep.subr.mxu1 %v162_v7  ;;  %309 = vmatpush3.msra.mxu0 %v67_v6  ;;  %p399_p5 = pnand %p398_p4, %p392_p1 }
  0x2f   :  { %310 = vmatprep.mubr.msk.f32.mxu0 %vm78_vm0, %v65_v8  ;;  %320 = vmatpush3.msra.mxu1 %v162_v7 }
  0x30   :  { %321 = vmatprep.mubr.msk.f32.mxu1 %vm78_vm0, %v65_v8  ;;  %311 = vmatmul.mubr.msk.f32.vlgmr.msra.gmra.mxu0 %vm78_vm0, %v66_v9 }
  0x31   :  { %322 = vmatmul.mubr.msk.f32.vlgmr.msra.gmra.mxu1 %vm78_vm0, %v66_v9 }
  0xf0   :  { %v312_v12 = vpop.f32.mrf.mxu0 }
  0xf1   :  { %v323_v13 = vpop.f32.mrf.mxu1  ;;  %v157_v14 = vadd.f32 %v312_v12, %v284_v10 }
  0xf2   :  { %v245_v15 = vadd.f32 %v323_v13, %v287_v11  ;;  %v151_v16 = vpop.f32.mrf.mxu0 }
  0xf3   :  { %v239_v17 = vpop.f32.mrf.mxu1  ;;  %161 = vst.msk [vmem:[#allocation8 + $0x8] sm:$0xff] %vm78_vm0, %v157_v14  ;;  %v152_v18 = vadd.f32 %v284_v10, %v151_v16 }
  0xf4   :  { %249 = vst.msk [vmem:[#allocation9 + $0x8] sm:$0xff] %vm78_vm0, %v245_v15  ;;  %v240_v19 = vadd.f32 %v287_v11, %v239_v17 }
  0xf5   :  { %160 = vst.msk [vmem:[#allocation8] sm:$0xff] %vm78_vm0, %v152_v18 }
  0xf6   :  { %248 = vst.msk [vmem:[#allocation9] sm:$0xff] %vm78_vm0, %v240_v19 }
  0xf7   :  { %402 = shalt.err (!%p399_p5)
}
  0xf8   :  { %261 = dma.vmem_to_hbm [thread:$0]  %s256_s16, 256, %s530_s5, [#allocation4], %s441_s26, %s441_s26, %s442_s27  }
  0xf9   :  { %s411_s20 = scalar_lea.vmem %s268_s18, 256  ;;  %p416_p7 = scmp.lt.s32.totalorder %s268_s18, %s268_s18 }
  0xfa   :  { %p412_p6 = scmp.ne.s32.totalorder %s268_s18, %s411_s20  ;;  %p417_p8 = scmp.lt.s32.totalorder %s411_s20, %s411_s20 }
  0xfc   :  { %p418_p9 = por %p417_p8, %p416_p7 }
  0xfe   :  { %p419_p10 = pnand %p418_p9, %p412_p6 }
 0x100   :  { %422 = shalt.err (!%p419_p10)
}
 0x101   :  { %273 = dma.vmem_to_hbm [thread:$0]  %s268_s18, 256, %s531_s6, [#allocation10], %s441_s26, %s441_s26, %s442_s27  }
 0x102   :  { %435 = dma.done.wait [#allocation4], 256  }
 0x103   :  { %436 = vsyncadd [#allocation4], 4294967040 }
 0x104   :  { %437 = dma.done.wait [#allocation10], 256  }
 0x105   :  { %438 = vsyncadd [#allocation10], 4294967040 }
 0x106   :  { %280 = vsyncpa [#allocation3], 1 }
 0x107   :  { %281 = vsyncpa [#allocation6], 1 }
 0x108   :  { %282 = vsyncpa [#allocation4], 1 }
 0x109   :  { %283 = vsyncpa [#allocation10], 1 }

</bundles_post_ra>
